<compile_context>
chip_gen: v5e
topology: v5e:2x2
jax: 0.10.0
libtpu: 0.0.40
codegen_flags: <defaults>
</compile_context>

<pallas_src>
import functools
import math

import jax
import jax.numpy as jnp
from jax.experimental import pallas as pl
from jax.experimental.pallas import tpu as pltpu


# ------------------------------ Pallas kernel -------------------------------

def _interaction_kernel(e1_ref, e2_ref, o_ref):
    # e1_ref: (1, tI, C), e2_ref: (1, tJ, C), o_ref: (1, tI, tJ, C)
    e1 = e1_ref[...]
    e2 = e2_ref[...]
    # out[0, i, j, c] = e1[0, i, c] * e2[0, j, c]
    o_ref[...] = e1[:, :, None, :] * e2[:, None, :, :]


# ------------------------------ helpers --------------------------------------

def _cdiv(a, b):
    return -(-a // b)


def _round_up(x, m):
    return _cdiv(x, m) * m


def _choose_tiles(L1, J, lane, itemsize, sub, out_budget):
    """Pick (tI, tJ).  Maximize tJ first (contiguous HBM writes, e2 reuse),
    then tI.  Budget is checked against the physically padded footprint."""
    lane_bytes = _round_up(lane, 128) * itemsize      # padded bytes of one row

    def out_block_bytes(ti, tj):
        return ti * _round_up(tj, sub) * lane_bytes

    if out_block_bytes(sub, J) <= out_budget:
        tJ = J                                         # full second extent fits
        max_ti = out_budget // (_round_up(J, sub) * lane_bytes)
        tI = L1 if max_ti >= L1 else max(sub, (max_ti // sub) * sub)
    else:
        tI = min(L1, sub)
        max_tj = out_budget // max(tI * lane_bytes, 1)
        tJ = min(J, max(sub, (max_tj // sub) * sub))
    return tI, tJ


# -------------------------------- wrapper -------------------------------------

@functools.partial(jax.jit, static_argnames=("max_block_bytes",))
def interaction(encoded_1, encoded_2, mask=None, *,
                max_block_bytes=8 * 1024 * 1024):
    """Pallas equivalent of Interaction.forward (mask ignored, as in PyTorch)."""
    del mask  # unused by the reference forward

    B, L1, D = encoded_1.shape
    B2, L2, D2 = encoded_2.shape
    assert B == B2 and D == D2, (encoded_1.shape, encoded_2.shape)

    out_dtype = jnp.result_type(encoded_1.dtype, encoded_2.dtype)
    e1 = encoded_1.astype(out_dtype)
    e2 = encoded_2.astype(out_dtype)
    itemsize = jnp.dtype(out_dtype).itemsize
    sub = max(8, 32 // itemsize)          # min sublane tile: f32->8, bf16->16, i8->32

    # ---- lane layout: make the output lane-dense when D < 128 ---------------
    # Fold whole (j, d) chunks of size C = lcm(D, 128) onto the lane axis so
    # stores are full-width and output DMA rows are long contiguous runs.
    C = (D * 128) // math.gcd(D, 128)
    regroup = (D % 128 != 0) and ((L2 * D) % C == 0)
    if regroup:
        reps = C // D
        e1_in = jnp.tile(e1, (1, 1, reps))            # (B, L1, C)  — tiny vs output
        J = (L2 * D) // C
        e2_in = e2.reshape(B, J, C)                   # free, contiguous reshape
        lane = C
    else:
        # D already a multiple of 128 (ideal) or shapes disallow regrouping
        # (rare fallback: correct, but stores are lane-masked).
        e1_in, e2_in, J, lane = e1, e2, L2, D

    # ---- tile selection (padded-footprint accounting) -----------------------
    out_budget = max(1 << 20, min(int(max_block_bytes), 16 * 1024 * 1024))
    tI, tJ = _choose_tiles(L1, J, lane, itemsize, sub, out_budget)

    # Best-effort megacore split: keep >= 2 grid blocks so both v7x TCs work.
    if B * _cdiv(L1, tI) * _cdiv(J, tJ) < 2:
        half_i = _round_up(_cdiv(L1, 2), sub)
        half_j = _round_up(_cdiv(J, 2), sub)
        if half_i < L1:
            tI = half_i
        elif half_j < J:
            tJ = half_j

    grid = (B, _cdiv(L1, tI), _cdiv(J, tJ))

    # ---- VMEM limit from the real (padded, double-buffered) footprint -------
    lane_bytes = _round_up(lane, 128) * itemsize
    out_blk = tI * _round_up(tJ, sub) * lane_bytes
    e1_blk = _round_up(tI, sub) * lane_bytes
    e2_blk = _round_up(tJ, sub) * lane_bytes
    need = 2 * (out_blk + e1_blk + e2_blk)
    vmem_limit = int(min(48 * 1024 * 1024, max(32 * 1024 * 1024, int(need * 1.25))))

    out = pl.pallas_call(
        _interaction_kernel,
        out_shape=jax.ShapeDtypeStruct((B, L1, J, lane), out_dtype),
        grid=grid,
        in_specs=[
            pl.BlockSpec((1, tI, lane), lambda b, i, j: (b, i, 0)),
            pl.BlockSpec((1, tJ, lane), lambda b, i, j: (b, j, 0)),
        ],
        out_specs=pl.BlockSpec((1, tI, tJ, lane), lambda b, i, j: (b, i, j, 0)),
        compiler_params=pltpu.CompilerParams(
            dimension_semantics=("parallel", "parallel", "parallel"),
            vmem_limit_bytes=vmem_limit,
        ),
    )(e1_in, e2_in)

    return out.reshape(B, L1, L2, D)


# ---------------------------------- main --------------------------------------

if __name__ == "__main__":
    key = jax.random.PRNGKey(0)
    k1, k2, k3, k4 = jax.random.split(key, 4)

    # Small shapes consistent with the module: (batch, seq, hidden) inputs.
    batch, seq1, seq2, hidden = 2, 8, 16, 32
    encoded_1 = jax.random.normal(k1, (batch, seq1, hidden), jnp.float32)
    encoded_2 = jax.random.normal(k2, (batch, seq2, hidden), jnp.float32)

    out = interaction(encoded_1, encoded_2)
    jax.block_until_ready(out)
    ref = encoded_1[:, :, None, :] * encoded_2[:, None, :, :]
    assert out.shape == (batch, seq1, seq2, hidden), out.shape
    assert out.dtype == jnp.float32
    assert jnp.allclose(out, ref, atol=1e-6, rtol=1e-6)

    # Also exercise the direct (D % 128 == 0, already lane-dense) path.
    hidden2 = 128
    e3 = jax.random.normal(k3, (batch, seq1, hidden2), jnp.float32)
    e4 = jax.random.normal(k4, (batch, seq2, hidden2), jnp.float32)
    out2 = interaction(e3, e4)
    jax.block_until_ready(out2)
    ref2 = e3[:, :, None, :] * e4[:, None, :, :]
    assert jnp.allclose(out2, ref2, atol=1e-6, rtol=1e-6)

    print("KERNEL_OK")
</pallas_src>

<mosaic_0001>
module attributes {stable_mosaic.version = 11 : i64} {
  func.func @_interaction_kernel(%arg0: i32, %arg1: i32, %arg2: i32, %arg3: memref<1x8x128xf32, #tpu.memory_space<vmem>>, %arg4: memref<1x4x128xf32, #tpu.memory_space<vmem>>, %arg5: memref<1x8x4x128xf32, #tpu.memory_space<vmem>>) attributes {dimension_semantics = [#tpu.dimension_semantics<parallel>, #tpu.dimension_semantics<parallel>, #tpu.dimension_semantics<parallel>], iteration_bounds = array<i64: 2, 1, 1>, scalar_prefetch = 0 : i64, scratch_operands = 0 : i64, tpu.core_type = #tpu.core_type<tc>, window_params = [{transform_indices = @transform_0, window_bounds = array<i64: 1, 8, 128>}, {transform_indices = @transform_1, window_bounds = array<i64: 1, 4, 128>}, {transform_indices = @transform_2, window_bounds = array<i64: 1, 8, 4, 128>}]} {
    %c0 = arith.constant 0 : index
    %c0_0 = arith.constant 0 : index
    %c0_1 = arith.constant 0 : index
    %0 = vector.load %arg3[%c0, %c0_0, %c0_1] : memref<1x8x128xf32, #tpu.memory_space<vmem>>, vector<1x8x128xf32>
    %c0_2 = arith.constant 0 : index
    %c0_3 = arith.constant 0 : index
    %c0_4 = arith.constant 0 : index
    %1 = vector.load %arg4[%c0_2, %c0_3, %c0_4] : memref<1x4x128xf32, #tpu.memory_space<vmem>>, vector<1x4x128xf32>
    %2 = vector.shape_cast %0 : vector<1x8x128xf32> to vector<1x8x1x128xf32>
    %3 = vector.shape_cast %1 : vector<1x4x128xf32> to vector<1x1x4x128xf32>
    %4 = vector.broadcast %2 : vector<1x8x1x128xf32> to vector<1x8x4x128xf32>
    %5 = vector.broadcast %3 : vector<1x1x4x128xf32> to vector<1x8x4x128xf32>
    %6 = arith.mulf %4, %5 : vector<1x8x4x128xf32>
    %c0_5 = arith.constant 0 : index
    %c0_6 = arith.constant 0 : index
    %c0_7 = arith.constant 0 : index
    %c0_8 = arith.constant 0 : index
    %7 = vector.load %arg5[%c0_5, %c0_6, %c0_7, %c0_8] : memref<1x8x4x128xf32, #tpu.memory_space<vmem>>, vector<1x8x4x128xf32>
    tpu.vector_store %arg5[%c0_5, %c0_6, %c0_7, %c0_8], %6 {strides = array<i32>} : memref<1x8x4x128xf32, #tpu.memory_space<vmem>>, vector<1x8x4x128xf32>,
    return
  }
  func.func @transform_0(%arg0: i32, %arg1: i32, %arg2: i32) -> (i32, i32, i32) {
    %c0_i32 = arith.constant 0 : i32
    %c0_i32_0 = arith.constant 0 : i32
    return %arg0, %arg1, %c0_i32 : i32, i32, i32
  }
  func.func @transform_1(%arg0: i32, %arg1: i32, %arg2: i32) -> (i32, i32, i32) {
    %c0_i32 = arith.constant 0 : i32
    %c0_i32_0 = arith.constant 0 : i32
    return %arg0, %arg2, %c0_i32 : i32, i32, i32
  }
  func.func @transform_2(%arg0: i32, %arg1: i32, %arg2: i32) -> (i32, i32, i32, i32) {
    %c0_i32 = arith.constant 0 : i32
    %c0_i32_0 = arith.constant 0 : i32
    return %arg0, %arg1, %arg2, %c0_i32 : i32, i32, i32, i32
  }
}

</mosaic_0001>

<bundles_post_ra>
// kernel: tile.9
= control target key start
LH: loop header
LB: loop body
LE: loop exit
PB: predicated region body
PF: predicated region fallthrough
CT: control target
= control target key end

     0   :  { %vm68_vm0 = vcmask 1047556   ;;  %s167_s9 = smov 64   ;;  %s168_s10 = smov 32   ;;  %vm70_vm1 = vcmask 261120   ;;  %vm89_vm2 = vcmask 1048320   ;;  %vm110_vm3 = vcmask 785920   ;;  %s259_s0 = inlined_call_operand.vmem [shape: f32[2,8,4,32], index: 0, kind: input, shape index: {}]   ;;  %s260_s1 = inlined_call_operand.vmem [shape: f32[2,8,128], index: 1, kind: output, shape index: {}]  }
   0x1   :  { %v152_v0 = vld [vmem:[%s259_s0 + $0x1c] sm:$0xf]  ;;  %v153_v1 = vld [vmem:[%s259_s0 + $0x18] sm:$0xf]  ;;  %v154_v2 = vld [vmem:[%s259_s0 + $0x14] sm:$0xf] }
   0x2   :  { %39 = vst [vmem:[#allocation0 + $0x38] sm:$0xf] %v152_v0  ;;  %v155_v3 = vld [vmem:[%s259_s0 + $0x10] sm:$0xf]  ;;  %v156_v4 = vld [vmem:[%s259_s0 + $0xc] sm:$0xf] }
   0x3   :  { %43 = vst [vmem:[#allocation0 + $0x30] sm:$0xf] %v153_v1  ;;  %v157_v5 = vld [vmem:[%s259_s0 + $0x8] sm:$0xf]  ;;  %v158_v6 = vld [vmem:[%s259_s0 + $0x4] sm:$0xf] }
   0x4   :  { %47 = vst [vmem:[#allocation0 + $0x28] sm:$0xf] %v154_v2  ;;  %v64_v7 = vld [vmem:[%s259_s0] sm:$0xf]  ;;  %v144_v8 = vld [vmem:[%s259_s0 + $0x3c] sm:$0xf] }
   0x5   :  { %51 = vst [vmem:[#allocation0 + $0x20] sm:$0xf] %v155_v3  ;;  %v145_v9 = vld [vmem:[%s259_s0 + $0x38] sm:$0xf]  ;;  %v146_v10 = vld [vmem:[%s259_s0 + $0x34] sm:$0xf] }
   0x6   :  { %55 = vst [vmem:[#allocation0 + $0x18] sm:$0xf] %v156_v4  ;;  %v147_v11 = vld [vmem:[%s259_s0 + $0x30] sm:$0xf]  ;;  %v148_v12 = vld [vmem:[%s259_s0 + $0x2c] sm:$0xf] }
   0x7   :  { %59 = vst [vmem:[#allocation0 + $0x10] sm:$0xf] %v157_v5  ;;  %v149_v13 = vld [vmem:[%s259_s0 + $0x28] sm:$0xf]  ;;  %v150_v15 = vld [vmem:[%s259_s0 + $0x24] sm:$0xf] }
   0x8   :  { %63 = vst [vmem:[#allocation0 + $0x8] sm:$0xf] %v158_v6  ;;  %v151_v17 = vld [vmem:[%s259_s0 + $0x20] sm:$0xf]  ;;  %s166_s0 = smov 96   ;;  %vm131_vm4 = vcmask 523520  }
   0x9   :  { %65 = vst [vmem:[#allocation0] sm:$0xf] %v64_v7 }
   0xa   :  { %7 = vst [vmem:[#allocation0 + $0x78] sm:$0xf] %v144_v8 }
   0xb   :  { %11 = vst [vmem:[#allocation0 + $0x70] sm:$0xf] %v145_v9 }
   0xc   :  { %v84_v14 = vld [vmem:[#allocation0 + $0x3] ss:$8 sm:$0xf0]   ;;  %15 = vst [vmem:[#allocation0 + $0x68] sm:$0xf] %v146_v10 }
   0xd   :  { %v105_v16 = vld [vmem:[#allocation0 + $0x2] ss:$8 sm:$0xf0]   ;;  %19 = vst [vmem:[#allocation0 + $0x60] sm:$0xf] %v147_v11 }
   0xe   :  { %23 = vst [vmem:[#allocation0 + $0x58] sm:$0xf] %v148_v12  ;;  %v126_v18 = vld [vmem:[#allocation0 + $0x1] ss:$8 sm:$0xf0]  }
   0xf   :  { %27 = vst [vmem:[#allocation0 + $0x50] sm:$0xf] %v149_v13  ;;  %v67_v35 = vld [vmem:[#allocation0] ss:$8 sm:$0xf0]  }
  0x10   :  { %v82_v19 = vld [vmem:[#allocation0 + $0x3] ss:$8 sm:$0xf]   ;;  %v103_v20 = vld [vmem:[#allocation0 + $0x2] ss:$8 sm:$0xf]  }
  0x11   :  { %v86_v21 = vsel %vm68_vm0, %v84_v14, %v82_v19  ;;  %v107_v22 = vsel %vm68_vm0, %v105_v16, %v103_v20  ;;  %v124_v23 = vld [vmem:[#allocation0 + $0x1] ss:$8 sm:$0xf]   ;;  %31 = vst [vmem:[#allocation0 + $0x48] sm:$0xf] %v150_v15 }
  0x12   :  { %87 = vrot.lane.b32.xlu0 %v86_v21, %s166_s0  ;;  %108 = vrot.lane.b32.xlu1 %v107_v22, %s167_s9  ;;  %v128_v24 = vsel %vm68_vm0, %v126_v18, %v124_v23  ;;  %35 = vst [vmem:[#allocation0 + $0x40] sm:$0xf] %v151_v17  ;;  %v66_v34 = vld [vmem:[#allocation0] ss:$8 sm:$0xf]  }
  0x13   :  { %129 = vrot.lane.b32.xlu2 %v128_v24, %s168_s10  ;;  %v69_v36 = vsel %vm68_vm0, %v67_v35, %v66_v34 }
  0x14   :  { %v94_v25 = vld [vmem:[#allocation0 + $0x43] ss:$8 sm:$0xf0]   ;;  %v115_v26 = vld [vmem:[#allocation0 + $0x42] ss:$8 sm:$0xf0]  }
  0x15   :  { %v136_v27 = vld [vmem:[#allocation0 + $0x41] ss:$8 sm:$0xf0]   ;;  %71 = vst.msk [vmem:[%s260_s1] sm:$0xff] %vm70_vm1, %v69_v36  }
  0x16   :  { %v75_v38 = vld [vmem:[#allocation0 + $0x40] ss:$8 sm:$0xf0]  }
  0x19   :  { %v92_v28 = vld [vmem:[#allocation0 + $0x43] ss:$8 sm:$0xf]   ;;  %v113_v29 = vld [vmem:[#allocation0 + $0x42] ss:$8 sm:$0xf]  }
  0x1a   :  { %v96_v30 = vsel %vm68_vm0, %v94_v25, %v92_v28  ;;  %v117_v31 = vsel %vm68_vm0, %v115_v26, %v113_v29  ;;  %v134_v32 = vld [vmem:[#allocation0 + $0x41] ss:$8 sm:$0xf]   ;;  %v73_v37 = vld [vmem:[#allocation0 + $0x40] ss:$8 sm:$0xf]  }
  0x1b   :  { %97 = vrot.lane.b32.xlu0 %v96_v30, %s166_s0  ;;  %118 = vrot.lane.b32.xlu1 %v117_v31, %s167_s9  ;;  %v138_v33 = vsel %vm68_vm0, %v136_v27, %v134_v32  ;;  %v77_v40 = vsel %vm68_vm0, %v75_v38, %v73_v37 }
  0x1c   :  { %139 = vrot.lane.b32.xlu2 %v138_v33, %s168_s10  ;;  %159 = vst.msk [vmem:[%s260_s1 + $0x8] sm:$0xff] %vm70_vm1, %v77_v40  }
  0x6d   :  { %v130_v39 = vpop.permute.xlu2 %129  }
  0x76   :  { %v140_v41 = vpop.permute.xlu2 %139  }
  0x84   :  { %v88_v42 = vpop.permute.xlu0 %87   ;;  %v109_v43 = vpop.permute.xlu1 %108  }
  0x85   :  { %90 = vst.msk [vmem:[%s260_s1] sm:$0xff] %vm89_vm2, %v88_v42  }
  0x86   :  { %111 = vst.msk [vmem:[%s260_s1] sm:$0xff] %vm110_vm3, %v109_v43  }
  0x87   :  { %132 = vst.msk [vmem:[%s260_s1] sm:$0xff] %vm131_vm4, %v130_v39  }
  0x8d   :  { %v98_v44 = vpop.permute.xlu0 %97   ;;  %v119_v45 = vpop.permute.xlu1 %118  }
  0x8e   :  { %160 = vst.msk [vmem:[%s260_s1 + $0x8] sm:$0xff] %vm89_vm2, %v98_v44  }
  0x8f   :  { %161 = vst.msk [vmem:[%s260_s1 + $0x8] sm:$0xff] %vm110_vm3, %v119_v45  }
  0x90   :  { %162 = vst.msk [vmem:[%s260_s1 + $0x8] sm:$0xff] %vm131_vm4, %v140_v41  }

// kernel: interaction.1
= control target key start
LH: loop header
LB: loop body
LE: loop exit
PB: predicated region body
PF: predicated region fallthrough
CT: control target
= control target key end

     0   :  { %s447_s9 = smov 0   ;;  %s449_s10 = smov 0   ;;  %s483_s0 = inlined_call_operand.vmem [shape: f32[2,8,128], index: 0, kind: input, shape index: {}]   ;;  %s484_s1 = inlined_call_operand.vmem [shape: f32[2,4,128], index: 1, kind: input, shape index: {}]   ;;  %s485_s2 = inlined_call_operand.vmem [shape: f32[2,8,4,128], index: 2, kind: output, shape index: {}]  }
   0x1   :  { %s451_s11 = smov 0  }
   0x2 LB: > { %s31_s12 = sadd.s32 1, %s426_s10  ;;  %p376_p0 = scmp.ge.s32.totalorder %s430_s11, 1  ;;  %s430_s11 = sphi %s451_s11, %s12_s11   ;;  %s426_s10 = sphi %s449_s10, %s487_s10   ;;  %s422_s9 = sphi %s447_s9, %s486_s9  }
   0x3   : > { %p33_p1 = scmp.ge.s32.totalorder %s31_s12, 2  ;;  %p153_p2 = scmp.lt.s32.totalorder %s430_s11, 3 }
   0x5   : > { %s489_s12 = smov (%p33_p1, %s31_s12), 0  ;;  %p154_p3 = pnand %p376_p0, %p153_p2 }
   0x6   : > { %p191_p4 = scmp.lt.s32.totalorder (!%p154_p3), %s422_s9, 1 }
   0x7   : > { %157 = sbr.rel (%p154_p3) target bundleno = 29 (0x1d), region = 28 }
   0xc   : > { %s491_s9 = smov (!%p191_p4, %s422_s9), 1 }
   0xd   : > { %s377_s13 = sshll.u32 %s491_s9, 3  ;;  %s378_s14 = sshll.u32 %s491_s9, 2 }
   0xe   : > { %s197_s17 = scalar_lea.vmem %s483_s0, %s377_s13  ;;  %s204_s20 = scalar_lea.vmem %s484_s1, %s378_s14 }
   0xf   : > { %s383_s21 = sshll.u32 %s491_s9, 5  ;;  %v218_v0 = vld [vmem:[%s197_s17] sm:$0xff] }
  0x10   : > { %v219_v1 = vld [vmem:[%s204_s20] sm:$0xf]  ;;  %v228_v2 = vperm.slane %v218_v0, 0  ;;  %v221_v3 = vrot.slane %v218_v0, 1  ;;  %v222_v4 = vrot.slane %v218_v0, 2  ;;  %v223_v5 = vrot.slane %v218_v0, 3  ;;  %s216_s24 = scalar_lea.vmem %s485_s2, %s383_s21 }
  0x11   : > { %v224_v6 = vrot.slane %v218_v0, 4  ;;  %v225_v7 = vrot.slane %v218_v0, 5  ;;  %v226_v8 = vrot.slane %v218_v0, 6  ;;  %v227_v9 = vrot.slane %v218_v0, 7 }
  0x12   : > { %v244_v10 = vmul.f32 %v228_v2, %v219_v1  ;;  %v229_v11 = vperm.slane %v221_v3, 0  ;;  %v230_v12 = vperm.slane %v222_v4, 0  ;;  %v231_v13 = vperm.slane %v223_v5, 0 }
  0x13   : > { %v232_v14 = vperm.slane %v224_v6, 0  ;;  %v233_v15 = vperm.slane %v225_v7, 0  ;;  %v234_v16 = vperm.slane %v226_v8, 0  ;;  %v235_v20 = vperm.slane %v227_v9, 0 }
  0x14   : > { %252 = vst [vmem:[%s216_s24] sm:$0xf] %v244_v10  ;;  %v245_v17 = vmul.f32 %v229_v11, %v219_v1  ;;  %v246_v18 = vmul.f32 %v230_v12, %v219_v1  ;;  %v247_v19 = vmul.f32 %v231_v13, %v219_v1 }
  0x15   : > { %v248_v21 = vmul.f32 %v232_v14, %v219_v1  ;;  %v249_v22 = vmul.f32 %v233_v15, %v219_v1  ;;  %v250_v23 = vmul.f32 %v234_v16, %v219_v1  ;;  %v251_v24 = vmul.f32 %v235_v20, %v219_v1 }
  0x16   : > { %253 = vst [vmem:[%s216_s24 + $0x4] sm:$0xf] %v245_v17 }
  0x17   : > { %254 = vst [vmem:[%s216_s24 + $0x8] sm:$0xf] %v246_v18 }
  0x18   : > { %255 = vst [vmem:[%s216_s24 + $0xc] sm:$0xf] %v247_v19 }
  0x19   : > { %256 = vst [vmem:[%s216_s24 + $0x10] sm:$0xf] %v248_v21 }
  0x1a   : > { %257 = vst [vmem:[%s216_s24 + $0x14] sm:$0xf] %v249_v22 }
  0x1b   : > { %258 = vst [vmem:[%s216_s24 + $0x18] sm:$0xf] %v250_v23 }
  0x1c   : > { %259 = vst [vmem:[%s216_s24 + $0x1c] sm:$0xf] %v251_v24 }
  0x1d PF: > { %s12_s11 = sadd.s32 1, %s430_s11   ;;  %s486_s9 = smov %s426_s10 }
  0x1e   : > { %p9_p5 = scmp.ge.s32.totalorder %s12_s11, 4   ;;  %s487_s10 = smov %s489_s12 }
  0x20   :  { %11 = sbr.rel (!%p9_p5) target bundleno = 2 (0x2), region = 61 }

</bundles_post_ra>
